<compile_context>
chip_gen: v7x
topology: tpu7x:2x2x1
jax: 0.10.0
libtpu: 0.0.40
codegen_flags: <defaults>
</compile_context>

<pallas_src>
import jax
import jax.numpy as jnp
from jax import lax
from jax.experimental import pallas as pl
from jax.experimental.pallas import tpu as pltpu


# ----------------------------------------------------------------------------
# Shared in-kernel helpers
# ----------------------------------------------------------------------------

def _add_segment(x, seg_col, seg_tbl_ref, nseg):
    """x: (tq, D) f32; seg_col: (tq, 1) int32; seg_tbl_ref: (nseg, D) Ref."""
    if nseg == 2:
        row0 = seg_tbl_ref[0:1, :].astype(jnp.float32)
        row1 = seg_tbl_ref[1:2, :].astype(jnp.float32)
        return x + jnp.where(seg_col == 0, row0, row1)
    # General nseg: one-hot matmul on the (otherwise idle) MXU.
    onehot = (seg_col == lax.broadcasted_iota(jnp.int32, (x.shape[0], nseg), 1))
    seg_emb = jnp.dot(onehot.astype(seg_tbl_ref.dtype), seg_tbl_ref[...],
                      preferred_element_type=jnp.float32,
                      precision=lax.Precision.HIGHEST)
    return x + seg_emb


def _layernorm_affine(x, gamma, beta, eps):
    """Biased-variance LayerNorm over the last axis (f32), fused moments."""
    d = x.shape[-1]
    inv_d = 1.0 / d
    s1 = jnp.sum(x, axis=-1, keepdims=True)
    s2 = jnp.sum(x * x, axis=-1, keepdims=True)
    mean = s1 * inv_d
    var = jnp.maximum(s2 * inv_d - mean * mean, 0.0)
    y = (x - mean) * lax.rsqrt(var + eps)
    return y * gamma + beta


# ----------------------------------------------------------------------------
# Path 1: small token table resident in VMEM, one-hot MXU gather
# ----------------------------------------------------------------------------

def _make_small_table_kernel(*, vocab, nseg, eps, use_seg):
    def kernel(ids_ref, tok_ref, pos_ref, *rest):
        if use_seg:
            seg_ids_ref, seg_tbl_ref, gamma_ref, beta_ref, out_ref = rest
        else:
            gamma_ref, beta_ref, out_ref = rest
            seg_ids_ref = seg_tbl_ref = None

        ids = ids_ref[...]                                          # (tq, 1) int32
        onehot = (ids == lax.broadcasted_iota(jnp.int32, (ids.shape[0], vocab), 1))
        # One-hot gather on the MXU; HIGHEST precision keeps the selection exact.
        x = jnp.dot(onehot.astype(tok_ref.dtype), tok_ref[...],
                    preferred_element_type=jnp.float32,
                    precision=lax.Precision.HIGHEST)
        x = x + pos_ref[...].astype(jnp.float32)
        if use_seg:
            x = _add_segment(x, seg_ids_ref[...], seg_tbl_ref, nseg)
        out_ref[...] = _layernorm_affine(
            x, gamma_ref[...].astype(jnp.float32),
            beta_ref[...].astype(jnp.float32), eps).astype(out_ref.dtype)

    return kernel


# ----------------------------------------------------------------------------
# Path 2: HBM row gather with a cross-step double-buffered DMA pipeline
# ----------------------------------------------------------------------------

def _make_hbm_gather_kernel(*, seq_len, tq, bpc, nseg, eps, use_seg, unroll):
    def kernel(ids_ref,          # SMEM (B*S,) int32 token ids (scalar prefetch)
               tok_hbm,          # HBM  (vocab, D) token table (pl.ANY, manual DMA)
               pos_ref,          # VMEM (tq, D) positional tile
               *rest):
        if use_seg:
            (seg_ids_ref, seg_tbl_ref, gamma_ref, beta_ref,
             out_ref, x_buf, sem) = rest
        else:
            gamma_ref, beta_ref, out_ref, x_buf, sem = rest
            seg_ids_ref = seg_tbl_ref = None

        p = pl.program_id(0)
        i = pl.program_id(1)
        n_inner = pl.num_programs(1)
        slot = lax.rem(i, 2)

        def issue_gather(inner_idx, slot_idx):
            # Flat row offset of tile `inner_idx` of parallel slice `p` inside the
            # (B*S,) id array.  multiple_of hint is valid because S % tq == 0.
            base = pl.multiple_of(p * (bpc * seq_len) + inner_idx * tq, tq)

            def body(r, carry):
                tok_id = ids_ref[base + r]        # already clipped in the wrapper
                pltpu.make_async_copy(
                    tok_hbm.at[pl.ds(tok_id, 1), :],
                    x_buf.at[slot_idx, pl.ds(r, 1), :],
                    sem.at[slot_idx],
                ).start()
                return carry

            lax.fori_loop(0, tq, body, 0, unroll=unroll)

        # Prime the pipeline at the first inner step of each parallel slice
        # (each slice is self-contained -> megacore-safe on v7x).
        @pl.when(i == 0)
        def _():
            issue_gather(0, 0)

        # Issue the NEXT tile's gather into the other slot BEFORE waiting on the
        # current slot: slots/semaphores are independent, so this hides the
        # descriptor-issue loop under the current tile's inbound DMA and keeps the
        # ids_ref SMEM reads ahead of the .wait().
        @pl.when(i + 1 < n_inner)
        def _():
            issue_gather(i + 1, 1 - slot)

        # Aggregate wait: tq row copies of D*itemsize each signal sem[slot].
        # Correct only while x_buf dtype == token-table dtype (kept in wrapper).
        pltpu.make_async_copy(x_buf.at[slot], x_buf.at[slot], sem.at[slot]).wait()

        x = x_buf[slot].astype(jnp.float32) + pos_ref[...].astype(jnp.float32)
        if use_seg:
            x = _add_segment(x, seg_ids_ref[...], seg_tbl_ref, nseg)
        out_ref[...] = _layernorm_affine(
            x, gamma_ref[...].astype(jnp.float32),
            beta_ref[...].astype(jnp.float32), eps).astype(out_ref.dtype)

    return kernel


# ----------------------------------------------------------------------------
# Wrapper
# ----------------------------------------------------------------------------

def input_embedding_forward(input_ids, params, seg_ids=None, *, tq=None, eps=1e-5,
                            out_dtype=jnp.float32, num_parallel=None,
                            force_hbm_gather=False,
                            small_table_bytes=2 * 1024 * 1024):
    """Pallas equivalent of input_embedding.forward(input, seg)."""
    B, S = input_ids.shape
    tok_tbl = params["token"]
    pos_tbl = params["pos"]
    seg_tbl = params["seg"]
    vocab, D = tok_tbl.shape
    nseg = seg_tbl.shape[0]
    assert pos_tbl.shape[0] >= S, "max_seq_len must cover the sequence length"

    use_seg = seg_ids is not None

    # Sequence tile: as large as possible (whole sequence, capped at 512 rows).
    if tq is None:
        tq = S if S <= 512 else 512
    assert S % tq == 0, "seq len must be divisible by the sequence tile size"
    assert tq % 8 == 0 or tq == S, "tile rows must be a multiple of 8 (or the full seq)"
    tiles_per_batch = S // tq

    gamma = params["gamma"].reshape(1, D).astype(jnp.float32)
    beta = params["beta"].reshape(1, D).astype(jnp.float32)
    pos_used = pos_tbl[:S]

    # OOB ids are clipped once here (vectorized, effectively free) instead of
    # per-row inside the DMA issue loop.  NOTE: this silently clamps out-of-range
    # ids instead of erroring like torch would.
    ids_clipped = jnp.clip(input_ids.astype(jnp.int32), 0, vocab - 1)
    if use_seg:
        seg_3d = jnp.clip(seg_ids.astype(jnp.int32), 0, nseg - 1).reshape(B, S, 1)

    # ------------------------------------------------------------------------
    # Path 1: small token table -> keep it resident in VMEM, no HBM gather DMAs.
    # ------------------------------------------------------------------------
    table_bytes = vocab * D * tok_tbl.dtype.itemsize
    if (not force_hbm_gather) and table_bytes <= small_table_bytes:
        kernel = _make_small_table_kernel(vocab=vocab, nseg=nseg, eps=eps,
                                          use_seg=use_seg)
        in_specs = [
            pl.BlockSpec((None, tq, 1), lambda b, t: (b, t, 0)),   # token ids
            pl.BlockSpec((vocab, D), lambda b, t: (0, 0)),          # resident table
            pl.BlockSpec((tq, D), lambda b, t: (t, 0)),             # positional tile
        ]
        args = [ids_clipped.reshape(B, S, 1), tok_tbl, pos_used]
        if use_seg:
            in_specs += [
                pl.BlockSpec((None, tq, 1), lambda b, t: (b, t, 0)),  # segment ids
                pl.BlockSpec((nseg, D), lambda b, t: (0, 0)),          # segment table
            ]
            args += [seg_3d, seg_tbl]
        in_specs += [
            pl.BlockSpec((1, D), lambda b, t: (0, 0)),               # gamma
            pl.BlockSpec((1, D), lambda b, t: (0, 0)),               # beta
        ]
        args += [gamma, beta]

        return pl.pallas_call(
            kernel,
            out_shape=jax.ShapeDtypeStruct((B, S, D), out_dtype),
            grid=(B, tiles_per_batch),
            in_specs=in_specs,
            out_specs=pl.BlockSpec((None, tq, D), lambda b, t: (b, t, 0)),
            compiler_params=pltpu.CompilerParams(
                dimension_semantics=("parallel", "arbitrary")),
        )(*args)

    # ------------------------------------------------------------------------
    # Path 2: large token table -> HBM row gather with a real DMA pipeline.
    # ------------------------------------------------------------------------
    # Parallel split (v7x megacore) only when each core still has >= 2 serial
    # inner steps to overlap gather DMAs with compute; otherwise fully serial so
    # cross-batch prefetch works on single-TC chips (v5e/v6e) too.
    if num_parallel is None:
        num_parallel = 2 if (B % 2 == 0 and (B // 2) * tiles_per_batch >= 2) else 1
    P = num_parallel
    assert B % P == 0, "batch must be divisible by num_parallel"
    bpc = B // P                              # batches per parallel slice
    n_inner = bpc * tiles_per_batch           # serial steps per parallel slice

    unroll = 16 if tq >= 128 else (8 if tq > 32 else True)
    kernel = _make_hbm_gather_kernel(seq_len=S, tq=tq, bpc=bpc, nseg=nseg,
                                     eps=eps, use_seg=use_seg, unroll=unroll)

    def tile_index(p, i, ids):
        b = p * bpc + i // tiles_per_batch
        t = i % tiles_per_batch
        return (b, t, 0)

    def pos_index(p, i, ids):
        return (i % tiles_per_batch, 0)

    def const_index(p, i, ids):
        return (0, 0)

    in_specs = [
        pl.BlockSpec(memory_space=pl.ANY),            # token table stays in HBM
        pl.BlockSpec((tq, D), pos_index),             # positional tile
    ]
    args = [tok_tbl, pos_used]
    if use_seg:
        in_specs += [
            pl.BlockSpec((None, tq, 1), tile_index),  # segment ids
            pl.BlockSpec((nseg, D), const_index),     # segment table
        ]
        args += [seg_3d, seg_tbl]
    in_specs += [
        pl.BlockSpec((1, D), const_index),            # gamma
        pl.BlockSpec((1, D), const_index),            # beta
    ]
    args += [gamma, beta]

    grid_spec = pltpu.PrefetchScalarGridSpec(
        num_scalar_prefetch=1,                        # flattened token ids -> SMEM
        grid=(P, n_inner),
        in_specs=in_specs,
        out_specs=pl.BlockSpec((None, tq, D), tile_index),
        scratch_shapes=[
            pltpu.VMEM((2, tq, D), tok_tbl.dtype),    # double-buffered gather target
            pltpu.SemaphoreType.DMA((2,)),
        ],
    )

    # Raise the scoped-VMEM limit only when large tiles need it (default ~32 MiB).
    vmem_est = (2 * tq * D * tok_tbl.dtype.itemsize             # x_buf
                + 2 * tq * D * jnp.dtype(out_dtype).itemsize    # out double buffer
                + 2 * tq * D * pos_used.dtype.itemsize)         # pos double buffer
    cp_kwargs = dict(dimension_semantics=("parallel", "arbitrary"))
    if vmem_est > 24 * 1024 * 1024:
        cp_kwargs["vmem_limit_bytes"] = min(int(2 * vmem_est), 96 * 1024 * 1024)

    return pl.pallas_call(
        kernel,
        out_shape=jax.ShapeDtypeStruct((B, S, D), out_dtype),
        grid_spec=grid_spec,
        compiler_params=pltpu.CompilerParams(**cp_kwargs),
    )(ids_clipped.reshape(-1), *args)


# ----------------------------------------------------------------------------
# Pure-JAX reference + self-test
# ----------------------------------------------------------------------------

def _reference(input_ids, params, seg_ids=None, eps=1e-5):
    B, S = input_ids.shape
    x = params["token"][input_ids] + params["pos"][jnp.arange(S)][None, :, :]
    if seg_ids is not None:
        x = x + params["seg"][seg_ids]
    mean = x.mean(-1, keepdims=True)
    var = ((x - mean) ** 2).mean(-1, keepdims=True)
    return (x - mean) / jnp.sqrt(var + eps) * params["gamma"] + params["beta"]


if __name__ == "__main__":
    # Small shapes consistent with the module: ebd_dim=32, vocab=64, max_seq_len=16.
    B, S, D = 2, 8, 32
    vocab, max_seq_len, num_seg = 64, 16, 2

    key = jax.random.PRNGKey(0)
    k1, k2, k3, k4, k5 = jax.random.split(key, 5)

    # Deterministic parameter init (nn.Embedding ~ N(0,1); LayerNorm gamma=1, beta=0).
    params = {
        "token": jax.random.normal(k1, (vocab, D), jnp.float32),
        "pos": jax.random.normal(k2, (max_seq_len, D), jnp.float32),
        "seg": jax.random.normal(k3, (num_seg, D), jnp.float32),
        "gamma": jnp.ones((D,), jnp.float32),
        "beta": jnp.zeros((D,), jnp.float32),
    }

    input_ids = jax.random.randint(k4, (B, S), 0, vocab, dtype=jnp.int32)
    seg_ids = jax.random.randint(k5, (B, S), 0, num_seg, dtype=jnp.int32)

    ref = _reference(input_ids, params, seg_ids=None)
    ref_seg = _reference(input_ids, params, seg_ids=seg_ids)

    # Small-table fast path (VMEM-resident table, one-hot MXU gather) — the branch
    # this config actually takes.
    out = input_embedding_forward(input_ids, params, seg_ids=None)
    jax.block_until_ready(out)
    assert out.shape == (B, S, D)
    assert jnp.allclose(out, ref, atol=1e-4, rtol=1e-4), "fast path mismatch (no seg)"

    out_seg = input_embedding_forward(input_ids, params, seg_ids=seg_ids)
    jax.block_until_ready(out_seg)
    assert jnp.allclose(out_seg, ref_seg, atol=1e-4, rtol=1e-4), "fast path mismatch (seg)"

    # HBM DMA-gather path (the large-vocab production path), forced at small shapes
    # so the cross-step double-buffered pipeline is exercised too.
    out_hbm = input_embedding_forward(input_ids, params, seg_ids=None,
                                      force_hbm_gather=True)
    jax.block_until_ready(out_hbm)
    assert jnp.allclose(out_hbm, ref, atol=1e-4, rtol=1e-4), "gather path mismatch (no seg)"

    out_hbm_seg = input_embedding_forward(input_ids, params, seg_ids=seg_ids,
                                          force_hbm_gather=True)
    jax.block_until_ready(out_hbm_seg)
    assert jnp.allclose(out_hbm_seg, ref_seg, atol=1e-4, rtol=1e-4), "gather path mismatch (seg)"

    print("KERNEL_OK")
</pallas_src>

<mosaic_0001>
module attributes {stable_mosaic.version = 11 : i64} {
  func.func @kernel(%arg0: i32, %arg1: i32, %arg2: memref<1x8x1xi32, #tpu.memory_space<vmem>>, %arg3: memref<64x32xf32, #tpu.memory_space<vmem>>, %arg4: memref<8x32xf32, #tpu.memory_space<vmem>>, %arg5: memref<1x32xf32, #tpu.memory_space<vmem>>, %arg6: memref<1x32xf32, #tpu.memory_space<vmem>>, %arg7: memref<1x8x32xf32, #tpu.memory_space<vmem>>) attributes {dimension_semantics = [#tpu.dimension_semantics<parallel>, #tpu.dimension_semantics<arbitrary>], iteration_bounds = array<i64: 2, 1>, scalar_prefetch = 0 : i64, scratch_operands = 0 : i64, tpu.core_type = #tpu.core_type<tc>, window_params = [{transform_indices = @transform_0, window_bounds = array<i64: 1, 8, 1>}, {pipeline_mode = #tpu.pipeline_mode<synchronous>, transform_indices = @transform_1, window_bounds = array<i64: 64, 32>}, {transform_indices = @transform_2, window_bounds = array<i64: 8, 32>}, {pipeline_mode = #tpu.pipeline_mode<synchronous>, transform_indices = @transform_3, window_bounds = array<i64: 1, 32>}, {pipeline_mode = #tpu.pipeline_mode<synchronous>, transform_indices = @transform_4, window_bounds = array<i64: 1, 32>}, {transform_indices = @transform_5, window_bounds = array<i64: 1, 8, 32>}]} {
    %c0 = arith.constant 0 : index
    %c0_0 = arith.constant 0 : index
    %c0_1 = arith.constant 0 : index
    %0 = vector.load %arg2[%c0, %c0_0, %c0_1] : memref<1x8x1xi32, #tpu.memory_space<vmem>>, vector<1x8x1xi32>
    %1 = vector.shape_cast %0 : vector<1x8x1xi32> to vector<8x1xi32>
    %2 = tpu.iota {dimensions = array<i32: 1>} : vector<8x64xi32>
    %3 = vector.broadcast %1 : vector<8x1xi32> to vector<8x64xi32>
    %4 = arith.cmpi eq, %3, %2 : vector<8x64xi32>
    %5 = arith.extui %4 : vector<8x64xi1> to vector<8x64xi32>
    %6 = arith.sitofp %5 : vector<8x64xi32> to vector<8x64xf32>
    %c0_2 = arith.constant 0 : index
    %c0_3 = arith.constant 0 : index
    %7 = vector.load %arg3[%c0_2, %c0_3] : memref<64x32xf32, #tpu.memory_space<vmem>>, vector<64x32xf32>
    %cst = arith.constant dense<0.000000e+00> : vector<8x32xf32>
    %8 = tpu.matmul %6, %7, %cst {dimension_numbers = #tpu.dot_dimension_numbers<[1], [0], [0], [1], [0, 0, 1, 1], [], []>, precision = #tpu.contract_precision<fp32>} : vector<8x64xf32>, vector<64x32xf32>, vector<8x32xf32> -> vector<8x32xf32>
    %c0_4 = arith.constant 0 : index
    %c0_5 = arith.constant 0 : index
    %9 = vector.load %arg4[%c0_4, %c0_5] : memref<8x32xf32, #tpu.memory_space<vmem>>, vector<8x32xf32>
    %10 = arith.addf %8, %9 : vector<8x32xf32>
    %c0_6 = arith.constant 0 : index
    %c0_7 = arith.constant 0 : index
    %11 = vector.load %arg5[%c0_6, %c0_7] : memref<1x32xf32, #tpu.memory_space<vmem>>, vector<1x32xf32>
    %c0_8 = arith.constant 0 : index
    %c0_9 = arith.constant 0 : index
    %12 = vector.load %arg6[%c0_8, %c0_9] : memref<1x32xf32, #tpu.memory_space<vmem>>, vector<1x32xf32>
    %cst_10 = arith.constant dense<0.000000e+00> : vector<8xf32>
    %13 = vector.multi_reduction <add>, %10, %cst_10 [1] : vector<8x32xf32> to vector<8xf32>
    %14 = vector.shape_cast %13 : vector<8xf32> to vector<8x1xf32>
    %15 = arith.mulf %10, %10 : vector<8x32xf32>
    %cst_11 = arith.constant dense<0.000000e+00> : vector<8xf32>
    %16 = vector.multi_reduction <add>, %15, %cst_11 [1] : vector<8x32xf32> to vector<8xf32>
    %17 = vector.shape_cast %16 : vector<8xf32> to vector<8x1xf32>
    %cst_12 = arith.constant 3.125000e-02 : f32
    %18 = vector.broadcast %cst_12 : f32 to vector<8x1xf32>
    %19 = arith.mulf %14, %18 : vector<8x1xf32>
    %cst_13 = arith.constant 3.125000e-02 : f32
    %20 = vector.broadcast %cst_13 : f32 to vector<8x1xf32>
    %21 = arith.mulf %17, %20 : vector<8x1xf32>
    %22 = arith.mulf %19, %19 : vector<8x1xf32>
    %23 = arith.subf %21, %22 : vector<8x1xf32>
    %cst_14 = arith.constant 0.000000e+00 : f32
    %24 = vector.broadcast %cst_14 : f32 to vector<8x1xf32>
    %25 = arith.maximumf %23, %24 : vector<8x1xf32>
    %26 = vector.broadcast %19 : vector<8x1xf32> to vector<8x32xf32>
    %27 = arith.subf %10, %26 : vector<8x32xf32>
    %cst_15 = arith.constant 9.99999974E-6 : f32
    %28 = vector.broadcast %cst_15 : f32 to vector<8x1xf32>
    %29 = arith.addf %25, %28 : vector<8x1xf32>
    %30 = math.rsqrt %29 : vector<8x1xf32>
    %31 = vector.broadcast %30 : vector<8x1xf32> to vector<8x32xf32>
    %32 = arith.mulf %27, %31 : vector<8x32xf32>
    %33 = vector.broadcast %11 : vector<1x32xf32> to vector<8x32xf32>
    %34 = arith.mulf %32, %33 : vector<8x32xf32>
    %35 = vector.broadcast %12 : vector<1x32xf32> to vector<8x32xf32>
    %36 = arith.addf %34, %35 : vector<8x32xf32>
    %c0_16 = arith.constant 0 : index
    %c0_17 = arith.constant 0 : index
    %c0_18 = arith.constant 0 : index
    %37 = vector.load %arg7[%c0_16, %c0_17, %c0_18] : memref<1x8x32xf32, #tpu.memory_space<vmem>>, vector<1x8x32xf32>
    %38 = vector.shape_cast %37 : vector<1x8x32xf32> to vector<8x32xf32>
    %39 = vector.shape_cast %36 : vector<8x32xf32> to vector<1x8x32xf32>
    tpu.vector_store %arg7[%c0_16, %c0_17, %c0_18], %39 {strides = array<i32>} : memref<1x8x32xf32, #tpu.memory_space<vmem>>, vector<1x8x32xf32>,
    return
  }
  func.func @transform_0(%arg0: i32, %arg1: i32) -> (i32, i32, i32) {
    %c0_i32 = arith.constant 0 : i32
    %c0_i32_0 = arith.constant 0 : i32
    return %arg0, %arg1, %c0_i32 : i32, i32, i32
  }
  func.func @transform_1(%arg0: i32, %arg1: i32) -> (i32, i32) {
    %c0_i32 = arith.constant 0 : i32
    %c0_i32_0 = arith.constant 0 : i32
    %c0_i32_1 = arith.constant 0 : i32
    return %c0_i32, %c0_i32_0 : i32, i32
  }
  func.func @transform_2(%arg0: i32, %arg1: i32) -> (i32, i32) {
    %c0_i32 = arith.constant 0 : i32
    %c0_i32_0 = arith.constant 0 : i32
    return %arg1, %c0_i32 : i32, i32
  }
  func.func @transform_3(%arg0: i32, %arg1: i32) -> (i32, i32) {
    %c0_i32 = arith.constant 0 : i32
    %c0_i32_0 = arith.constant 0 : i32
    %c0_i32_1 = arith.constant 0 : i32
    return %c0_i32, %c0_i32_0 : i32, i32
  }
  func.func @transform_4(%arg0: i32, %arg1: i32) -> (i32, i32) {
    %c0_i32 = arith.constant 0 : i32
    %c0_i32_0 = arith.constant 0 : i32
    %c0_i32_1 = arith.constant 0 : i32
    return %c0_i32, %c0_i32_0 : i32, i32
  }
  func.func @transform_5(%arg0: i32, %arg1: i32) -> (i32, i32, i32) {
    %c0_i32 = arith.constant 0 : i32
    %c0_i32_0 = arith.constant 0 : i32
    return %arg0, %arg1, %c0_i32 : i32, i32, i32
  }
}

</mosaic_0001>

<bundles_post_ra>
// kernel: tpu_custom_call.1
= control target key start
LH: loop header
LB: loop body
LE: loop exit
PB: predicated region body
PF: predicated region fallthrough
CT: control target
= control target key end

     0   :  { %10 = vsyncpa [#allocation3], 0  ;;  %s1652_s0 = inlined_call_operand.vmem [shape: s32[2,8,1], index: 0, kind: input, shape index: {}]   ;;  %s1653_s1 = inlined_call_operand.vmem [shape: f32[64,32], index: 1, kind: input, shape index: {}]   ;;  %s1654_s2 = inlined_call_operand.vmem [shape: f32[8,32], index: 2, kind: input, shape index: {}]   ;;  %s1655_s3 = inlined_call_operand.vmem [shape: f32[1,32], index: 3, kind: input, shape index: {}]   ;;  %s1656_s4 = inlined_call_operand.vmem [shape: f32[1,32], index: 4, kind: input, shape index: {}]   ;;  %s1657_s5 = inlined_call_operand.hbm [shape: f32[2,8,32], index: 5, kind: output, shape index: {}]  }
   0x1   :  { %12 = vsyncpa [#allocation3 + $0x1], 0  ;;  %s1401_s18 = smov 0   ;;  %s1403_s19 = smov 0  }
   0x2   :  { %s1405_s20 = smov 0   ;;  %s1407_s21 = smov 0  }
   0x3   :  { %s1409_s22 = smov 0   ;;  %s1411_s23 = smov 0  }
   0x4 LB: > { %s956_s24 = sadd.s32 4294967295, %s1364_s23   ;;  %s957_s25 = sadd.s32 4294967294, %s1364_s23   ;;  %s1364_s23 = sphi %s1411_s23, %s18_s23   ;;  %s1360_s22 = sphi %s1409_s22, %s1664_s22   ;;  %s1356_s21 = sphi %s1407_s21, %s1663_s21   ;;  %s1352_s20 = sphi %s1405_s20, %s1662_s20   ;;  %s1348_s19 = sphi %s1403_s19, %s1661_s19   ;;  %s1344_s18 = sphi %s1401_s18, %s1660_s18  }
   0x5   : > { %s30_s26 = sadd.s32 1, %s1360_s22  ;;  %s156_s27 = sadd.s32 1, %s1352_s20 }
   0x6   : > { %p32_p0 = scmp.ge.s32.totalorder %s30_s26, 2  ;;  %p166_p1 = scmp.ne.s32.totalorder %s1352_s20, %s1348_s19 }
   0x7   : > { %p167_p2 = scmp.eq.s32.totalorder %s956_s24, 1  ;;  %p172_p3 = scmp.ne.s32.totalorder %s1348_s19, %s1344_s18 }
   0x8   : > { %s1666_s26 = smov (%p32_p0, %s30_s26), 0  ;;  %p173_p5 = scmp.eq.s32.totalorder %s957_s25, 1 }
   0x9   : > { %p1441_p4 = por %p167_p2, %p166_p1  ;;  %s151_s29 = ssub.s32 %s1360_s22, %s1666_s26 }
   0xa   : > { %p961_p6 = scmp.ge.s32.totalorder %s1364_s23, 1  ;;  %p154_p7 = scmp.eq.s32.totalorder %s151_s29, 0 }
   0xb   : > { %p1448_p8 = por %p173_p5, %p172_p3  ;;  %p217_p9 = scmp.lt.s32.totalorder %s1364_s23, 3 }
   0xc   : > { %s1454_s6 = scalar_select %p154_p7, %s1352_s20, %s156_s27  }
   0xd   : > { %p218_p10 = pnand %p961_p6, %p217_p9 }
   0xe   : > { %p251_p11 = scmp.lt.s32.totalorder (!%p218_p10), %s1356_s21, 1  ;;  %v271_v0 = vld [vmem:[%s1653_s1] sm:$0xff] (!%p218_p10)  ;;  %v272_v1 = vld [vmem:[%s1653_s1 + $0x8] sm:$0xff] (!%p218_p10)  ;;  %v273_v2 = vld [vmem:[%s1653_s1 + $0x10] sm:$0xff] (!%p218_p10)  ;;  %v1366_v3 = vmov (!%p218_p10), 0   ;;  %v1367_v4 = vmov (!%p218_p10), 0.0|0.0  }
   0xf   : > { %221 = sbr.rel (%p218_p10) target bundleno = 598 (0x256), region = 40  ;;  %1283 = vset.pattern.permute.xlu0 (!%p218_p10), %v1366_v3  ;;  %1178 = vmatprep.subr.bf16.mxu0 (!%p218_p10), %v1367_v4  ;;  %v285_v5 = vand.u32 (!%p218_p10), 4294901760, %v271_v0  ;;  %v288_v6 = vand.u32 (!%p218_p10), 4294901760, %v272_v1  ;;  %v274_v7 = vld [vmem:[%s1653_s1 + $0x18] sm:$0xff] (!%p218_p10)  ;;  %v291_v8 = vand.u32 (!%p218_p10), 4294901760, %v273_v2  ;;  %v275_v9 = vld [vmem:[%s1653_s1 + $0x20] sm:$0xff] (!%p218_p10) }
  0x10   : > { %v276_v10 = vld [vmem:[%s1653_s1 + $0x28] sm:$0xff] (!%p218_p10)  ;;  %1142 = vmatprep.subr.bf16.mxu1 (!%p218_p10), %v1367_v4  ;;  %v294_v11 = vand.u32 (!%p218_p10), 4294901760, %v274_v7  ;;  %v297_v12 = vand.u32 (!%p218_p10), 4294901760, %v275_v9  ;;  %v277_v22 = vld [vmem:[%s1653_s1 + $0x30] sm:$0xff] (!%p218_p10)  ;;  %v278_v23 = vld [vmem:[%s1653_s1 + $0x38] sm:$0xff] (!%p218_p10)  ;;  %vm1368_vm0 = vmmov (!%p218_p10), 0  }
  0x11   : > { %v300_v13 = vand.u32 (!%p218_p10), 4294901760, %v276_v10  ;;  %v1480_v14 = vpack.c.bf16 (!%p218_p10), %v288_v6, %v285_v5  ;;  %v1482_v15 = vsub.f32 (!%p218_p10), %v271_v0, %v285_v5  ;;  %v1484_v16 = vsub.f32 (!%p218_p10), %v272_v1, %v288_v6  ;;  %s248_s15 = sand.u32 (!%p218_p10), 1, %s1348_s19   ;;  %s971_s29 = sshll.u32 (!%p218_p10), %s1356_s21, 7 }
  0x12   : > { %v1486_v17 = vsub.f32 (!%p218_p10), %v273_v2, %v291_v8  ;;  %v1488_v18 = vsub.f32 (!%p218_p10), %v274_v7, %v294_v11  ;;  %v1490_v19 = vsub.f32 (!%p218_p10), %v275_v9, %v297_v12  ;;  %v1497_v20 = vpack.c.bf16 (!%p218_p10), %v294_v11, %v291_v8  ;;  %s962_s16 = sshll.u32 (!%p218_p10), %s248_s15, 3  ;;  %s1604_s11 = scalar_lea.hbm (!%p218_p10), %s1657_s5, %s971_s29 }
  0x13   : > { %1180 = vmatpush3.bf16.msra.mxu0 (!%p218_p10), %v1480_v14  ;;  %1144 = vmatpush3.bf16.msra.mxu1 (!%p218_p10), %v1480_v14  ;;  %v1499_v21 = vsub.f32 (!%p218_p10), %v276_v10, %v300_v13  ;;  %v303_v25 = vand.u32 (!%p218_p10), 4294901760, %v277_v22  ;;  %v306_v26 = vand.u32 (!%p218_p10), 4294901760, %v278_v23  ;;  %v1511_v27 = vpack.c.bf16 (!%p218_p10), %v300_v13, %v297_v12  ;;  %s250_s7 = scalar_lea.vmem (!%p218_p10), [#allocation2], %s962_s16  ;;  %s856_s12 = scalar_lea.sflag (!%p218_p10), [#allocation3], %s248_s15 }
  0x14   : > { %1181 = vmatprep.subr.bf16.mxu0 (!%p218_p10), %v1367_v4  ;;  %1145 = vmatprep.subr.bf16.mxu1 (!%p218_p10), %v1367_v4  ;;  %v370_v30 = vand.u32 (!%p218_p10), 4294901760, %v1482_v15  ;;  %v1369_v31 = vmov (!%p218_p10), 0.0   ;;  %v377_v32 = vand.u32 (!%p218_p10), 4294901760, %v1484_v16  ;;  %v384_v39 = vand.u32 (!%p218_p10), 4294901760, %v1486_v17 }
  0x15   : > { %v1515_v28 = vsub.f32 (!%p218_p10), %v277_v22, %v303_v25  ;;  %v1517_v29 = vsub.f32 (!%p218_p10), %v278_v23, %v306_v26  ;;  %1101 = vmatprep.mubr.msk.f32.mxu0 (!%p218_p10), %vm1368_vm0, %v1369_v31  ;;  %1044 = vmatprep.mubr.msk.f32.mxu1 (!%p218_p10), %vm1368_vm0, %v1369_v31  ;;  %v1525_v33 = vpack.c.bf16 (!%p218_p10), %v306_v26, %v303_v25  ;;  %v391_v40 = vand.u32 (!%p218_p10), 4294901760, %v1488_v18 }
  0x16   : > { %s252_s25 = scalar_select %p251_p11, %s1356_s21, 1  ;;  %v1191_v34 = vpack.c.bf16 %v377_v32, %v370_v30  ;;  %v371_v35 = vsub.f32 %v1482_v15, %v370_v30  ;;  %v378_v36 = vsub.f32 %v1484_v16, %v377_v32  ;;  %v385_v43 = vsub.f32 %v1486_v17, %v384_v39 }
  0x17   : > { %1183 = vmatpush3.bf16.msra.mxu0 %v1497_v20  ;;  %1147 = vmatpush3.bf16.msra.mxu1 %v1497_v20  ;;  %v1194_v42 = vpack.c.bf16 %v391_v40, %v384_v39  ;;  %v392_v44 = vsub.f32 %v1488_v18, %v391_v40  ;;  %v398_v46 = vand.u32 4294901760, %v1490_v19  ;;  %v405_v47 = vand.u32 4294901760, %v1499_v21  ;;  %s1370_s21 = smov [#allocation2]  }
  0x18   : > { %s963_s27 = sshll.u32 %s252_s25, 3  ;;  %1184 = vmatprep.subr.bf16.mxu0 %v1367_v4  ;;  %1148 = vmatprep.subr.bf16.mxu1 %v1367_v4  ;;  %v372_v37 = vand.u32 4294901760, %v371_v35  ;;  %v379_v38 = vand.u32 4294901760, %v378_v36  ;;  %v386_v45 = vand.u32 4294901760, %v385_v43  ;;  %v412_v55 = vand.u32 4294901760, %v1515_v28  ;;  %s1290_s14 = sshll.u32 %s1370_s21, 4  ;;  %s1291_s14 = int_to_ptr.vmem [resolvable:$false] %s1290_s14 }
  0x19   : > { %s257_s8 = scalar_lea.vmem %s1652_s0, %s963_s27  ;;  %v393_v48 = vand.u32 4294901760, %v392_v44  ;;  %v1197_v49 = vpack.c.bf16 %v405_v47, %v398_v46  ;;  %v399_v50 = vsub.f32 %v1490_v19, %v398_v46  ;;  %v406_v51 = vsub.f32 %v1499_v21, %v405_v47  ;;  %v969_v35 = vld [vmem:[%s1656_s4] ss:$0 sm:$0xff]  ;;  %s1292_s16 = scalar_lea.vmem %s1291_s14, 256 }
  0x1a   : > { %v262_v24 = vld [vmem:[%s257_s8] sm:$0xff]  ;;  %v1155_v41 = vpack.c.bf16 %v379_v38, %v372_v37  ;;  %v419_v56 = vand.u32 4294901760, %v1517_v29  ;;  %v413_v59 = vsub.f32 %v1515_v28, %v412_v55  ;;  %v1167_v0 = vpack.c.bf16 %v1484_v16, %v1482_v15  ;;  %s870_s8 = sshll.u32 %s250_s7, 4  ;;  %s1606_s8 = int_to_ptr.vmem [resolvable:$true] %s870_s8 }
  0x1b   : > { %266 = vperm.xlu0 %1283, %v262_v24   ;;  %1186 = vmatpush3.bf16.msra.mxu0 %v1511_v27  ;;  %v1158_v52 = vpack.c.bf16 %v393_v48, %v386_v45  ;;  %v400_v53 = vand.u32 4294901760, %v399_v50  ;;  %v407_v54 = vand.u32 4294901760, %v406_v51  ;;  %v1170_v1 = vpack.c.bf16 %v1488_v18, %v1486_v17  ;;  %v279_v16 = vld [vmem:[%s1654_s2] sm:$0xff]  ;;  %s1286_s13 = scalar_lea.vmem %s1606_s8, 128  ;;  %p1293_p1 = scmp.lt.s32.totalorder %s1606_s8, %s1291_s14 }
  0x1c   : > { %1150 = vmatpush3.bf16.msra.mxu1 %v1511_v27  ;;  %1187 = vmatprep.subr.bf16.mxu0 %v1367_v4  ;;  %v1200_v58 = vpack.c.bf16 %v419_v56, %v412_v55  ;;  %v420_v60 = vsub.f32 %v1517_v29, %v419_v56  ;;  %v414_v61 = vand.u32 4294901760, %v413_v59  ;;  %v1173_v2 = vpack.c.bf16 %v1499_v21, %v1490_v19  ;;  %p1287_p12 = scmp.ne.s32.totalorder %s1606_s8, %s1286_s13  ;;  %p1294_p2 = scmp.lt.s32.totalorder %s1292_s16, %s1286_s13 }
  0x1d   : > { %1151 = vmatprep.subr.bf16.mxu1 %v1367_v4  ;;  %v1161_v57 = vpack.c.bf16 %v407_v54, %v400_v53  ;;  %v1176_v3 = vpack.c.bf16 %v1517_v29, %v1515_v28  ;;  %v263_v5 = vlaneseq  ;;  %vm280_vm1 = vcmask 523264  }
  0x1e   : > { %v421_v62 = vand.u32 4294901760, %v420_v60  ;;  %vm823_vm3 = vcmask 261120   ;;  %p1288_p13 = pnand %p1287_p12, %p1441_p4  ;;  %p1295_p3 = por %p1294_p2, %p1293_p1 }
  0x1f   : > { %1189 = vmatpush3.bf16.msra.mxu0 %v1525_v33  ;;  %v264_v6 = vand.u32 127, %v263_v5 }
  0x20   : > { %1153 = vmatpush3.bf16.msra.mxu1 %v1525_v33  ;;  %1190 = vmatprep.subr.bf16.mxu0 %v1367_v4  ;;  %v1164_v63 = vpack.c.bf16 %v421_v62, %v414_v61  ;;  %p1289_p0 = pneg %p1288_p13 }
  0x21   : > { %1154 = vmatprep.subr.bf16.mxu1 %v1367_v4 }
  0x22   : > { %p1296_p5 = pnand %p1295_p3, %p1289_p0 }
  0x9a   : > { %v267_v7 = vpop.permute.xlu0 %266 }
  0x9b   : > { %vm268_vm2 = vcmp.eq.s32.totalorder %v267_v7, %v264_v6 }
  0x9c   : > { %v964_v8 = vsel %vm268_vm2, 1.0, %v1369_v31 }
  0x9d   : > { %v282_v9 = vsel %vm280_vm1, %v964_v8, 0 }
  0x9e   : > { %v358_v10 = vsub.f32 %v282_v9, %v282_v9 }
  0xa0   : > { %v359_v11 = vand.u32 4294901760, %v358_v10 }
  0xa2   : > { %1102 = vmatmul.mubr.f32.vlgmr.msra.gmra.mrb[0].mxu0 %v359_v11  ;;  %v360_v12 = vsub.f32 %v358_v10, %v359_v11 }
  0xa3   : > { %1192 = vmatpush3.bf16.msra.mxu0 %v1191_v34  ;;  %1120 = vmatprep.mubr.msk.f32.mxu0 %vm1368_vm0, %v1369_v31 }
  0xa4   : > { %1193 = vmatprep.subr.bf16.mxu0 %v1367_v4  ;;  %v361_v13 = vand.u32 4294901760, %v360_v12 }
  0xa6   : > { %1045 = vmatmul.mubr.f32.vlgmr.msra.gmra.mrb[0].mxu1 %v361_v13 }
  0xa7   : > { %1156 = vmatpush3.bf16.msra.mxu1 %v1155_v41  ;;  %1195 = vmatpush3.bf16.msra.mxu0 %v1194_v42 }
  0xa8   : > { %1157 = vmatprep.subr.bf16.mxu1 %v1367_v4  ;;  %1196 = vmatprep.subr.bf16.mxu0 %v1367_v4 }
  0xa9   : > { %1063 = vmatprep.mubr.msk.f32.mxu1 %vm1368_vm0, %v1369_v31 }
  0xab   : > { %1159 = vmatpush3.bf16.msra.mxu1 %v1158_v52  ;;  %1198 = vmatpush3.bf16.msra.mxu0 %v1197_v49 }
  0xac   : > { %1160 = vmatprep.subr.bf16.mxu1 %v1367_v4  ;;  %1199 = vmatprep.subr.bf16.mxu0 %v1367_v4 }
  0xaf   : > { %1162 = vmatpush3.bf16.msra.mxu1 %v1161_v57  ;;  %1201 = vmatpush3.bf16.msra.mxu0 %v1200_v58 }
  0xb0   : > { %1163 = vmatprep.subr.bf16.mxu1 %v1367_v4  ;;  %1202 = vmatprep.subr.bf16.mxu0 %v1367_v4 }
  0xb2   : > { %1121 = vmatmul.mubr.msk.f32.vlgmr.msra.gmra.mrb[0].mxu0 %vm280_vm1, %v964_v8 }
  0xb3   : > { %1165 = vmatpush3.bf16.msra.mxu1 %v1164_v63  ;;  %1204 = vmatpush3.bf16.msra.mxu0 %v1480_v14 }
  0xb4   : > { %1166 = vmatprep.subr.bf16.mxu1 %v1367_v4  ;;  %1205 = vmatprep.subr.bf16.mxu0 %v1367_v4 }
  0xb5   : > { %1139 = vmatprep.mubr.msk.f32.mxu0 %vm1368_vm0, %v1369_v31 }
  0xb6   : > { %1064 = vmatmul.mubr.msk.f32.vlgmr.msra.gmra.mrb[0].mxu1 %vm280_vm1, %v964_v8 }
  0xb7   : > { %1168 = vmatpush3.bf16.msra.mxu1 %v1167_v0  ;;  %1207 = vmatpush3.bf16.msra.mxu0 %v1497_v20 }
  0xb8   : > { %1169 = vmatprep.subr.bf16.mxu1 %v1367_v4  ;;  %1208 = vmatprep.subr.bf16.mxu0 %v1367_v4 }
  0xb9   : > { %1082 = vmatprep.mubr.msk.f32.mxu1 %vm1368_vm0, %v1369_v31 }
  0xbb   : > { %1171 = vmatpush3.bf16.msra.mxu1 %v1170_v1  ;;  %1210 = vmatpush3.bf16.msra.mxu0 %v1511_v27 }
  0xbc   : > { %1172 = vmatprep.subr.bf16.mxu1 %v1367_v4  ;;  %1211 = vmatprep.subr.bf16.mxu0 %v1367_v4 }
  0xbf   : > { %1174 = vmatpush3.bf16.msra.mxu1 %v1173_v2  ;;  %1213 = vmatpush3.bf16.msra.mxu0 %v1525_v33  ;;  %v968_v33 = vld [vmem:[%s1655_s3] ss:$0 sm:$0xff] }
  0xc0   : > { %1175 = vmatprep.subr.bf16.mxu1 %v1367_v4 }
  0xc2   : > { %1140 = vmatmul.mubr.msk.f32.vlgmr.msra.gmra.mrb[0].mxu0 %vm280_vm1, %v964_v8 }
  0xc3   : > { %1177 = vmatpush3.bf16.msra.mxu1 %v1176_v3 }
  0xc6   : > { %1083 = vmatmul.mubr.f32.vlgmr.msra.gmra.mrb[0].mxu1 %v358_v10 }
 0x195   : > { %v817_v14 = vpop.f32.mrb[0].mxu0 }
 0x196   : > { %v1141_v15 = vpop.f32.mrb[1].mxu0 }
 0x199   : > { %v562_v17 = vpop.f32.mrb[0].mxu1 }
 0x19a   : > { %v1214_v18 = vadd.f32 %v562_v17, %v279_v16  ;;  %v1084_v19 = vpop.f32.mrb[1].mxu1 }
 0x19c   : > { %v1215_v20 = vadd.f32 %v1214_v18, %v817_v14 }
 0x19e   : > { %v824_v21 = vsel %vm823_vm3, %v1215_v20, 0.0  ;;  %v827_v22 = vmul.f32 %v1215_v20, %v1215_v20 }
 0x19f   : > { %825 = vadd.xlane.f32.xlu0 %v824_v21 }
 0x1a0   : > { %v828_v4 = vsel %vm823_vm3, %v827_v22, 0.0 }
 0x1a1   : > { %829 = vadd.xlane.f32.xlu1 %v828_v4 }
 0x22c   : > { %v826_v23 = vpop.xlane.xlu0 %825 }
 0x22d   : > { %v831_v24 = vmul.f32 0.03125, %v826_v23 }
 0x22e   : > { %v830_v25 = vpop.xlane.xlu1 %829 }
 0x22f   : > { %v833_v26 = vmul.f32 %v831_v24, %v831_v24  ;;  %v832_v27 = vmul.f32 0.03125, %v830_v25  ;;  %v836_v31 = vsub.f32 %v1215_v20, %v831_v24 }
 0x231   : > { %v834_v28 = vsub.f32 %v832_v27, %v833_v26 }
 0x233   : > { %v835_v29 = vmax.f32 %v834_v28, 0.0 }
 0x235   : > { %v837_v30 = vadd.f32 1e-05, %v835_v29 }
 0x237   : > { %1284 = vrsqrt.f32 %v837_v30 }
 0x241   : > { %v1285_v32 = vpop.eup %1284 }
 0x242   : > { %v839_v34 = vmul.f32 %v1285_v32, %v836_v31 }
 0x244   : > { %v846_v36 = vmul.f32 %v968_v33, %v839_v34 }
 0x246   : > { %v853_v37 = vadd.f32 %v969_v35, %v846_v36 }
 0x248   : > { %854 = vst.msk [vmem:[%s250_s7] sm:$0xff] %vm823_vm3, %v853_v37 }
 0x249   : > { %1299 = shalt.err (!%p1296_p5)
}
 0x24a   : > { %s1300_s15 = scalar_lea.hbm %s1604_s11, 128  ;;  %s1304_s25 = scalar_lea.hbm %s1657_s5, 256 }
 0x24b   : > { %p1301_p6 = scmp.ne.s32.totalorder %s1604_s11, %s1300_s15  ;;  %p1305_p10 = scmp.lt.u32.totalorder %s1604_s11, %s1657_s5 }
 0x24c   : > { %p1306_p11 = scmp.lt.u32.totalorder %s1304_s25, %s1300_s15  ;;  %p1308_p13 = scmp.lt.u32.totalorder %s1300_s15, %s1604_s11 }
 0x24d   : > { %p1302_p7 = pnand %p1301_p6, %p1441_p4 }
 0x24e   : > { %p1307_p12 = por %p1306_p11, %p1305_p10 }
 0x24f   : > { %p1303_p9 = pneg %p1302_p7 }
 0x250   : > { %p1309_p0 = por %p1308_p13, %p1307_p12 }
 0x252   : > { %p1310_p1 = pnand %p1309_p0, %p1303_p9 }
 0x254   : > { %1313 = shalt.err (!%p1310_p1)
}
 0x255   : > { %1224 = dma.vmem_to_hbm [thread:$0]  (%p1441_p4), %s1606_s8, 128, %s1604_s11, %s856_s12  }
 0x256 PF: > { %p1230_p2 = scmp.ge.s32.totalorder %s1364_s23, 2  ;;  %s882_s7 = sand.u32 1, %s1344_s18  }
 0x257   : > { %s883_s9 = scalar_lea.sflag [#allocation3], %s882_s7 }
 0x258   : > { %p1227_p3 = pnand %p1230_p2, %p1448_p8 }
 0x25a   : > { %1339 = dma.done.wait (!%p1227_p3), %s883_s9, 128  }
 0x25b   : > { %1341 = vsyncadd (!%p1227_p3), %s883_s9, 4294967168  ;;  %s18_s23 = sadd.s32 1, %s1364_s23   ;;  %s1660_s18 = smov %s1348_s19 }
 0x25c   : > { %p15_p5 = scmp.ge.s32.totalorder %s18_s23, 4   ;;  %s1661_s19 = smov %s1352_s20 }
 0x25d   : > { %s1662_s20 = smov %s1454_s6  ;;  %s1663_s21 = smov %s1360_s22 }
 0x25e   : > { %s1664_s22 = smov %s1666_s26  ;;  %17 = sbr.rel (!%p15_p5) target bundleno = 4 (0x4), region = 78 }
 0x265   :  { %888 = vsyncpa [#allocation3], 1 }
 0x266   :  { %890 = vsyncpa [#allocation3 + $0x1], 1 }

</bundles_post_ra>
